<compile_context>
chip_gen: v6e
topology: v6e:2x2x1
jax: 0.10.0
libtpu: 0.0.40
codegen_flags: <defaults>
</compile_context>

<pallas_src>
import jax
import jax.numpy as jnp
from jax.experimental import pallas as pl
from jax.experimental.pallas import tpu as pltpu


def _attention_kernel(enc_ref, dec_ref, mask_ref, cov_ref,
                      w_enc_ref, w_dec_gate_ref, w_cov_ref,
                      w_l1_ref, b_l1_ref, w_att_ref,
                      w_gate_ctx_ref, b_g_ref,
                      out_ref):
    TB, S, E = enc_ref.shape
    A = w_enc_ref.shape[1]

    enc = enc_ref[...]            # [TB, S, E]
    dec = dec_ref[...]            # [TB, D]
    mask = mask_ref[...]          # [TB, S]
    cov = cov_ref[...]            # [TB, S]

    # ---- additive attention features (MXU, M = TB*S rows) -----------------
    enc2 = enc.reshape(TB * S, E)                     # free re-view (S % 8 == 0)
    proj_enc = jnp.dot(enc2, w_enc_ref[...],
                       preferred_element_type=jnp.float32).reshape(TB, S, A)

    # Fused decoder-side projections: one matmul with N = 2A, sliced after.
    dec_both = jnp.dot(dec, w_dec_gate_ref[...],
                       preferred_element_type=jnp.float32)           # [TB, 2A]
    proj_dec = dec_both[:, :A]                                        # additive term
    gate_dec = dec_both[:, A:]                                        # gate's dec term

    # coverage_projection: Linear(1, A, bias=False) == rank-1 outer product.
    w_cov = w_cov_ref[0, :]                                           # [A]
    attn_in = proj_enc + proj_dec[:, None, :] + cov[:, :, None] * w_cov[None, None, :]
    feat = jnp.tanh(attn_in)                                          # [TB, S, A]
    # TODO(synk): if the bundle shows the EUP slot saturating on v6e/v7x, run
    # the tanh chain in bf16 (keep f32 on v5e, which has no bf16 EUP).

    # Extra attention layer (num_layers=2): tanh(layer(feat) + feat).
    feat2 = feat.reshape(TB * S, A)
    layer_out = jnp.dot(feat2, w_l1_ref[...], preferred_element_type=jnp.float32)
    feat2 = jnp.tanh(layer_out + b_l1_ref[0, :][None, :] + feat2)
    feat = feat2.reshape(TB, S, A)

    # attention_weight: Linear(A, 1, bias=False) -> VPU multiply + lane reduce
    # (A is small; an MXU push with a single output column would waste lanes).
    w_att = w_att_ref[0, :]
    scores = jnp.sum(feat * w_att[None, None, :], axis=-1)            # [TB, S]

    # masked_fill(mask == 0, -1e9); exact 0/1 f32 mask matches the reference.
    scores = jnp.where(mask == 0.0, jnp.float32(-1000000000.0), scores)

    # Softmax over the (untiled) sequence axis; normalize with one EUP
    # reciprocal per row + a VPU multiply instead of a full-tile divide.
    m = jnp.max(scores, axis=-1, keepdims=True)
    e = jnp.exp(scores - m)
    inv = pl.reciprocal(jnp.sum(e, axis=-1, keepdims=True), approx=False)
    weights = e * inv                                                 # [TB, S]

    # Context vector: VPU broadcast-multiply + sublane reduction over S
    # (avoids TB serialized M=1 MXU matvecs on the vex slot).
    ctx = jnp.sum(weights[:, :, None] * enc, axis=1)                  # [TB, E]

    # Gating: sigmoid(ctx @ Wg_ctx + dec @ Wg_dec + b) * ctx   (A == E).
    gate_lin = (jnp.dot(ctx, w_gate_ctx_ref[...],
                        preferred_element_type=jnp.float32)
                + gate_dec + b_g_ref[0, :][None, :])
    ctx = jax.nn.sigmoid(gate_lin) * ctx

    # Lane-dense packed output slab: [ context | attention_weights | new_cov ].
    out_ref[...] = jnp.concatenate(
        [ctx, weights, cov + weights], axis=-1).astype(out_ref.dtype)


def _vmem_budget_bytes():
    """Generation-aware (working-set budget, vmem_limit_bytes)."""
    try:
        phys = pltpu.get_tpu_info().vmem_capacity_bytes
    except Exception:
        phys = 64 << 20                      # conservative default (v7x per-TC)
    if phys >= (100 << 20):                  # v5e / v6e: 128 MiB physical
        return 56 << 20, 96 << 20
    return 24 << 20, 48 << 20                # v7x: 64 MiB physical


def _pick_batch_tile(B, S, E, D, A, budget_bytes, max_batch_tile=None):
    """Largest multiple-of-8 batch tile whose fp32 working set fits the budget,
    capped near B/2 so the grid always has >= 2 steps (both v7x TensorCores get
    work and the double-buffered enc DMA overlaps compute)."""
    bpe = 4
    per_row = (2 * S * E                 # enc tile (double-buffered)
               + 6 * S * A               # proj_enc / attn_in / feat / layer temps
               + 10 * S                  # mask / cov / scores / weights
               + 2 * (E + 2 * S)         # packed output (double-buffered)
               + 4 * (E + A + D)) * bpe
    fixed = 2 * (E * A + 2 * D * A + A * A + E * A + 4 * A) * bpe   # resident weights
    cap = (budget_bytes - fixed) // max(per_row, 1)

    tb = max(8, (cap // 8) * 8)                         # VMEM budget cap
    grid_cap = max(8, (((B + 1) // 2) + 7) // 8 * 8)    # keep >= 2 grid steps
    tb = min(tb, grid_cap)
    if max_batch_tile is not None:
        tb = min(tb, max(8, (max_batch_tile // 8) * 8))
    # Note: when the budget / grid caps allow, TB*S >= 256 is preferred so the
    # flattened MXU matmuls fill the systolic-array rows; at tiny B the
    # >=2-grid-steps cap above takes precedence.
    return tb


def enhanced_bahdanau_attention(enc, dec, mask, coverage, params, *, max_batch_tile=None):
    """Full enhanced-attention forward, batch-tiled over a 1-D Pallas grid."""
    B, S, E = enc.shape
    D = dec.shape[1]
    A = params["w_enc"].shape[1]
    assert A == E, "gating (gate * context) requires attention_size == encoder_hidden_size"
    assert S % 8 == 0, "seq_len must be a multiple of 8 so flattening reshapes stay free"
    # TODO(synk): pad S (with mask=0) instead of asserting, for ragged sequences.

    budget, vmem_limit = _vmem_budget_bytes()
    TB = _pick_batch_tile(B, S, E, D, A, budget, max_batch_tile=max_batch_tile)

    # Pad the batch up to a multiple of TB (padded rows are zeros / mask=0 and
    # are sliced away below) -- never fall back to an all-in-VMEM single step.
    B_pad = ((B + TB - 1) // TB) * TB
    if B_pad != B:
        pad = B_pad - B
        enc = jnp.pad(enc, ((0, pad), (0, 0), (0, 0)))
        dec = jnp.pad(dec, ((0, pad), (0, 0)))
        mask = jnp.pad(mask, ((0, pad), (0, 0)))
        coverage = jnp.pad(coverage, ((0, pad), (0, 0)))
    grid = (B_pad // TB,)

    # Fuse the two decoder-side projections (shared LHS, tiny N) once here and
    # split the gate weight into its ctx / dec halves.
    w_dec_gate = jnp.concatenate([params["w_dec"], params["w_g"][E:, :]], axis=1)  # [D, 2A]
    w_gate_ctx = params["w_g"][:E, :]                                              # [E, A]

    row_map = lambda b: (b, 0)
    row3_map = lambda b: (b, 0, 0)
    const_map = lambda b: (0, 0)

    OUTW = E + 2 * S
    in_specs = [
        pl.BlockSpec((TB, S, E), row3_map),     # encoder_states
        pl.BlockSpec((TB, D), row_map),         # decoder_state
        pl.BlockSpec((TB, S), row_map),         # encoder_mask
        pl.BlockSpec((TB, S), row_map),         # coverage
        pl.BlockSpec((E, A), const_map),        # w_enc      (resident across steps)
        pl.BlockSpec((D, 2 * A), const_map),    # w_dec_gate (fused dec proj + gate-dec)
        pl.BlockSpec((1, A), const_map),        # w_cov
        pl.BlockSpec((A, A), const_map),        # w_l1
        pl.BlockSpec((1, A), const_map),        # b_l1
        pl.BlockSpec((1, A), const_map),        # w_att
        pl.BlockSpec((E, A), const_map),        # w_gate_ctx
        pl.BlockSpec((1, A), const_map),        # b_g
    ]
    out_specs = pl.BlockSpec((TB, OUTW), row_map)
    out_shape = jax.ShapeDtypeStruct((B_pad, OUTW), jnp.float32)

    flops = int(2 * B_pad * S * E * A + 2 * B_pad * D * 2 * A + 2 * B_pad * S * A * A
                + 2 * B_pad * S * A + 2 * B_pad * S * E + 2 * B_pad * E * A)
    transcendentals = int(2 * B_pad * S * A + B_pad * S + B_pad * A + B_pad)
    bytes_accessed = int(4 * (B_pad * S * E + B_pad * D + 2 * B_pad * S
                              + E * A + 2 * D * A + A * A + E * A + 4 * A
                              + B_pad * OUTW))

    packed = pl.pallas_call(
        _attention_kernel,
        out_shape=out_shape,
        grid=grid,
        in_specs=in_specs,
        out_specs=out_specs,
        compiler_params=pltpu.CompilerParams(
            dimension_semantics=("parallel",),      # batch tiles shard across TCs on v7x
            vmem_limit_bytes=int(vmem_limit)),
        cost_estimate=pl.CostEstimate(
            flops=flops, transcendentals=transcendentals,
            bytes_accessed=bytes_accessed),
    )(enc, dec, mask, coverage,
      params["w_enc"], w_dec_gate, params["w_cov"],
      params["w_l1"], params["b_l1"], params["w_att"],
      w_gate_ctx, params["b_g"])

    context = packed[:B, :E]
    attn_weights = packed[:B, E:E + S]
    new_coverage = packed[:B, E + S:]
    return context, attn_weights, new_coverage


def _xavier_uniform(key, fan_in, fan_out, shape):
    bound = (6.0 / (fan_in + fan_out)) ** 0.5
    return jax.random.uniform(key, shape, jnp.float32, -bound, bound)


def make_params(key, E, D, A):
    ks = jax.random.split(key, 8)
    # weights stored as [in, out] (transpose of PyTorch's [out, in])
    return {
        "w_enc": _xavier_uniform(ks[0], E, A, (E, A)),
        "w_dec": _xavier_uniform(ks[1], D, A, (D, A)),
        "w_att": _xavier_uniform(ks[2], A, 1, (1, A)),
        "w_l1":  _xavier_uniform(ks[3], A, A, (A, A)),
        "b_l1":  jax.random.uniform(ks[4], (1, A), jnp.float32, -0.05, 0.05),
        "w_cov": _xavier_uniform(ks[5], 1, A, (1, A)),
        "w_g":   _xavier_uniform(ks[6], E + D, A, (E + D, A)),   # fused gate Linear(E+D, A)
        "b_g":   jax.random.uniform(ks[7], (1, A), jnp.float32, -0.05, 0.05),
    }


def reference_forward(enc, dec, mask, coverage, p):
    """Plain-JAX reference replicating the PyTorch forward."""
    proj_enc = enc @ p["w_enc"]
    proj_dec = dec @ p["w_dec"]
    attn_in = proj_enc + proj_dec[:, None, :]
    attn_in = attn_in + coverage[:, :, None] * p["w_cov"][0][None, None, :]
    feat = jnp.tanh(attn_in)
    feat = jnp.tanh(feat @ p["w_l1"] + p["b_l1"][0] + feat)
    scores = jnp.sum(feat * p["w_att"][0][None, None, :], axis=-1)
    scores = jnp.where(mask == 0.0, -1000000000.0, scores)
    weights = jax.nn.softmax(scores, axis=-1)
    ctx = jnp.sum(weights[:, :, None] * enc, axis=1)
    gate_in = jnp.concatenate([ctx, dec], axis=-1)
    gate = jax.nn.sigmoid(gate_in @ p["w_g"] + p["b_g"][0])
    return gate * ctx, weights, coverage + weights


if __name__ == "__main__":
    # A == E required by the PyTorch gating broadcast (gate_value * context).
    B, S, E, D, A = 16, 8, 32, 32, 32

    key = jax.random.PRNGKey(0)
    k_enc, k_dec, k_cov, k_par = jax.random.split(key, 4)

    enc = jax.random.normal(k_enc, (B, S, E), jnp.float32)
    dec = jax.random.normal(k_dec, (B, D), jnp.float32)
    coverage = jax.random.uniform(k_cov, (B, S), jnp.float32)
    mask = jnp.ones((B, S), jnp.float32).at[:, S - 2:].set(0.0)  # mask last 2 positions

    params = make_params(k_par, E, D, A)

    # max_batch_tile=8 -> TB=8, grid=(2,): exercises the >=2-step pipelined grid.
    ctx, attw, newcov = enhanced_bahdanau_attention(
        enc, dec, mask, coverage, params, max_batch_tile=8)
    jax.block_until_ready((ctx, attw, newcov))

    ctx_r, attw_r, newcov_r = reference_forward(enc, dec, mask, coverage, params)
    assert jnp.allclose(ctx, ctx_r, rtol=1e-4, atol=1e-4)
    assert jnp.allclose(attw, attw_r, rtol=1e-4, atol=1e-4)
    assert jnp.allclose(newcov, newcov_r, rtol=1e-4, atol=1e-4)

    print("KERNEL_OK")
</pallas_src>

<mosaic_0001>
module attributes {stable_mosaic.version = 11 : i64} {
  func.func @_attention_kernel(%arg0: i32, %arg1: memref<8x8x32xf32, #tpu.memory_space<vmem>>, %arg2: memref<8x32xf32, #tpu.memory_space<vmem>>, %arg3: memref<8x8xf32, #tpu.memory_space<vmem>>, %arg4: memref<8x8xf32, #tpu.memory_space<vmem>>, %arg5: memref<32x32xf32, #tpu.memory_space<vmem>>, %arg6: memref<32x64xf32, #tpu.memory_space<vmem>>, %arg7: memref<1x32xf32, #tpu.memory_space<vmem>>, %arg8: memref<32x32xf32, #tpu.memory_space<vmem>>, %arg9: memref<1x32xf32, #tpu.memory_space<vmem>>, %arg10: memref<1x32xf32, #tpu.memory_space<vmem>>, %arg11: memref<32x32xf32, #tpu.memory_space<vmem>>, %arg12: memref<1x32xf32, #tpu.memory_space<vmem>>, %arg13: memref<8x48xf32, #tpu.memory_space<vmem>>) attributes {dimension_semantics = [#tpu.dimension_semantics<parallel>], iteration_bounds = array<i64: 2>, scalar_prefetch = 0 : i64, scratch_operands = 0 : i64, tpu.core_type = #tpu.core_type<tc>, window_params = [{transform_indices = @transform_0, window_bounds = array<i64: 8, 8, 32>}, {transform_indices = @transform_1, window_bounds = array<i64: 8, 32>}, {transform_indices = @transform_2, window_bounds = array<i64: 8, 8>}, {transform_indices = @transform_3, window_bounds = array<i64: 8, 8>}, {pipeline_mode = #tpu.pipeline_mode<synchronous>, transform_indices = @transform_4, window_bounds = array<i64: 32, 32>}, {pipeline_mode = #tpu.pipeline_mode<synchronous>, transform_indices = @transform_5, window_bounds = array<i64: 32, 64>}, {pipeline_mode = #tpu.pipeline_mode<synchronous>, transform_indices = @transform_6, window_bounds = array<i64: 1, 32>}, {pipeline_mode = #tpu.pipeline_mode<synchronous>, transform_indices = @transform_7, window_bounds = array<i64: 32, 32>}, {pipeline_mode = #tpu.pipeline_mode<synchronous>, transform_indices = @transform_8, window_bounds = array<i64: 1, 32>}, {pipeline_mode = #tpu.pipeline_mode<synchronous>, transform_indices = @transform_9, window_bounds = array<i64: 1, 32>}, {pipeline_mode = #tpu.pipeline_mode<synchronous>, transform_indices = @transform_10, window_bounds = array<i64: 32, 32>}, {pipeline_mode = #tpu.pipeline_mode<synchronous>, transform_indices = @transform_11, window_bounds = array<i64: 1, 32>}, {transform_indices = @transform_12, window_bounds = array<i64: 8, 48>}]} {
    %c0 = arith.constant 0 : index
    %c0_0 = arith.constant 0 : index
    %c0_1 = arith.constant 0 : index
    %0 = vector.load %arg1[%c0, %c0_0, %c0_1] : memref<8x8x32xf32, #tpu.memory_space<vmem>>, vector<8x8x32xf32>
    %c0_2 = arith.constant 0 : index
    %c0_3 = arith.constant 0 : index
    %1 = vector.load %arg2[%c0_2, %c0_3] : memref<8x32xf32, #tpu.memory_space<vmem>>, vector<8x32xf32>
    %c0_4 = arith.constant 0 : index
    %c0_5 = arith.constant 0 : index
    %2 = vector.load %arg3[%c0_4, %c0_5] : memref<8x8xf32, #tpu.memory_space<vmem>>, vector<8x8xf32>
    %c0_6 = arith.constant 0 : index
    %c0_7 = arith.constant 0 : index
    %3 = vector.load %arg4[%c0_6, %c0_7] : memref<8x8xf32, #tpu.memory_space<vmem>>, vector<8x8xf32>
    %4 = vector.shape_cast %0 : vector<8x8x32xf32> to vector<64x32xf32>
    %c0_8 = arith.constant 0 : index
    %c0_9 = arith.constant 0 : index
    %5 = vector.load %arg5[%c0_8, %c0_9] : memref<32x32xf32, #tpu.memory_space<vmem>>, vector<32x32xf32>
    %cst = arith.constant dense<0.000000e+00> : vector<64x32xf32>
    %6 = tpu.matmul %4, %5, %cst {dimension_numbers = #tpu.dot_dimension_numbers<[1], [0], [0], [1], [0, 0, 1, 1], [], []>} : vector<64x32xf32>, vector<32x32xf32>, vector<64x32xf32> -> vector<64x32xf32>
    %7 = vector.shape_cast %6 : vector<64x32xf32> to vector<8x8x32xf32>
    %c0_10 = arith.constant 0 : index
    %c0_11 = arith.constant 0 : index
    %8 = vector.load %arg6[%c0_10, %c0_11] : memref<32x64xf32, #tpu.memory_space<vmem>>, vector<32x64xf32>
    %cst_12 = arith.constant dense<0.000000e+00> : vector<8x64xf32>
    %9 = tpu.matmul %1, %8, %cst_12 {dimension_numbers = #tpu.dot_dimension_numbers<[1], [0], [0], [1], [0, 0, 1, 1], [], []>} : vector<8x32xf32>, vector<32x64xf32>, vector<8x64xf32> -> vector<8x64xf32>
    %10 = vector.extract_strided_slice %9 {offsets = [0, 0], sizes = [8, 32], strides = [1, 1]} : vector<8x64xf32> to vector<8x32xf32>
    %11 = vector.extract_strided_slice %9 {offsets = [0, 32], sizes = [8, 32], strides = [1, 1]} : vector<8x64xf32> to vector<8x32xf32>
    %c0_13 = arith.constant 0 : index
    %c0_14 = arith.constant 0 : index
    %12 = vector.load %arg7[%c0_13, %c0_14] : memref<1x32xf32, #tpu.memory_space<vmem>>, vector<1x32xf32>
    %13 = vector.shape_cast %12 : vector<1x32xf32> to vector<32xf32>
    %14 = vector.shape_cast %10 : vector<8x32xf32> to vector<8x1x32xf32>
    %15 = vector.broadcast %14 : vector<8x1x32xf32> to vector<8x8x32xf32>
    %16 = arith.addf %7, %15 : vector<8x8x32xf32>
    %17 = vector.shape_cast %3 : vector<8x8xf32> to vector<8x8x1xf32>
    %18 = vector.shape_cast %13 : vector<32xf32> to vector<1x1x32xf32>
    %19 = vector.broadcast %17 : vector<8x8x1xf32> to vector<8x8x32xf32>
    %20 = vector.broadcast %18 : vector<1x1x32xf32> to vector<8x8x32xf32>
    %21 = arith.mulf %19, %20 : vector<8x8x32xf32>
    %22 = arith.addf %16, %21 : vector<8x8x32xf32>
    %23 = math.tanh %22 : vector<8x8x32xf32>
    %24 = vector.shape_cast %23 : vector<8x8x32xf32> to vector<64x32xf32>
    %c0_15 = arith.constant 0 : index
    %c0_16 = arith.constant 0 : index
    %25 = vector.load %arg8[%c0_15, %c0_16] : memref<32x32xf32, #tpu.memory_space<vmem>>, vector<32x32xf32>
    %cst_17 = arith.constant dense<0.000000e+00> : vector<64x32xf32>
    %26 = tpu.matmul %24, %25, %cst_17 {dimension_numbers = #tpu.dot_dimension_numbers<[1], [0], [0], [1], [0, 0, 1, 1], [], []>} : vector<64x32xf32>, vector<32x32xf32>, vector<64x32xf32> -> vector<64x32xf32>
    %c0_18 = arith.constant 0 : index
    %c0_19 = arith.constant 0 : index
    %27 = vector.load %arg9[%c0_18, %c0_19] : memref<1x32xf32, #tpu.memory_space<vmem>>, vector<1x32xf32>
    %28 = vector.shape_cast %27 : vector<1x32xf32> to vector<32xf32>
    %29 = vector.shape_cast %28 : vector<32xf32> to vector<1x32xf32>
    %30 = vector.broadcast %29 : vector<1x32xf32> to vector<64x32xf32>
    %31 = arith.addf %26, %30 : vector<64x32xf32>
    %32 = arith.addf %31, %24 : vector<64x32xf32>
    %33 = math.tanh %32 : vector<64x32xf32>
    %34 = vector.shape_cast %33 : vector<64x32xf32> to vector<8x8x32xf32>
    %c0_20 = arith.constant 0 : index
    %c0_21 = arith.constant 0 : index
    %35 = vector.load %arg10[%c0_20, %c0_21] : memref<1x32xf32, #tpu.memory_space<vmem>>, vector<1x32xf32>
    %36 = vector.shape_cast %35 : vector<1x32xf32> to vector<32xf32>
    %37 = vector.shape_cast %36 : vector<32xf32> to vector<1x1x32xf32>
    %38 = vector.broadcast %37 : vector<1x1x32xf32> to vector<8x8x32xf32>
    %39 = arith.mulf %34, %38 : vector<8x8x32xf32>
    %cst_22 = arith.constant dense<0.000000e+00> : vector<8x8xf32>
    %40 = vector.multi_reduction <add>, %39, %cst_22 [2] : vector<8x8x32xf32> to vector<8x8xf32>
    %cst_23 = arith.constant 0.000000e+00 : f32
    %41 = vector.broadcast %cst_23 : f32 to vector<8x8xf32>
    %42 = arith.cmpf oeq, %2, %41 : vector<8x8xf32>
    %cst_24 = arith.constant -1.000000e+09 : f32
    %43 = vector.broadcast %cst_24 : f32 to vector<8x8xf32>
    %44 = arith.select %42, %43, %40 : vector<8x8xi1>, vector<8x8xf32>
    %cst_25 = arith.constant dense<0xFF800000> : vector<8xf32>
    %45 = vector.multi_reduction <maximumf>, %44, %cst_25 [1] : vector<8x8xf32> to vector<8xf32>
    %46 = vector.shape_cast %45 : vector<8xf32> to vector<8x1xf32>
    %47 = vector.broadcast %46 : vector<8x1xf32> to vector<8x8xf32>
    %48 = arith.subf %44, %47 : vector<8x8xf32>
    %49 = math.exp %48 : vector<8x8xf32>
    %cst_26 = arith.constant dense<0.000000e+00> : vector<8xf32>
    %50 = vector.multi_reduction <add>, %49, %cst_26 [1] : vector<8x8xf32> to vector<8xf32>
    %51 = vector.shape_cast %50 : vector<8xf32> to vector<8x1xf32>
    %52 = tpu.reciprocal %51 : vector<8x1xf32> -> vector<8x1xf32>
    %53 = vector.broadcast %52 : vector<8x1xf32> to vector<8x8xf32>
    %54 = arith.mulf %49, %53 : vector<8x8xf32>
    %55 = vector.shape_cast %54 : vector<8x8xf32> to vector<8x8x1xf32>
    %56 = vector.broadcast %55 : vector<8x8x1xf32> to vector<8x8x32xf32>
    %57 = arith.mulf %56, %0 : vector<8x8x32xf32>
    %cst_27 = arith.constant dense<0.000000e+00> : vector<8x32xf32>
    %58 = vector.multi_reduction <add>, %57, %cst_27 [1] : vector<8x8x32xf32> to vector<8x32xf32>
    %c0_28 = arith.constant 0 : index
    %c0_29 = arith.constant 0 : index
    %59 = vector.load %arg11[%c0_28, %c0_29] : memref<32x32xf32, #tpu.memory_space<vmem>>, vector<32x32xf32>
    %cst_30 = arith.constant dense<0.000000e+00> : vector<8x32xf32>
    %60 = tpu.matmul %58, %59, %cst_30 {dimension_numbers = #tpu.dot_dimension_numbers<[1], [0], [0], [1], [0, 0, 1, 1], [], []>} : vector<8x32xf32>, vector<32x32xf32>, vector<8x32xf32> -> vector<8x32xf32>
    %61 = arith.addf %60, %11 : vector<8x32xf32>
    %c0_31 = arith.constant 0 : index
    %c0_32 = arith.constant 0 : index
    %62 = vector.load %arg12[%c0_31, %c0_32] : memref<1x32xf32, #tpu.memory_space<vmem>>, vector<1x32xf32>
    %63 = vector.shape_cast %62 : vector<1x32xf32> to vector<32xf32>
    %64 = vector.shape_cast %63 : vector<32xf32> to vector<1x32xf32>
    %65 = vector.broadcast %64 : vector<1x32xf32> to vector<8x32xf32>
    %66 = arith.addf %61, %65 : vector<8x32xf32>
    %67 = arith.negf %66 : vector<8x32xf32>
    %68 = math.exp %67 : vector<8x32xf32>
    %cst_33 = arith.constant 1.000000e+00 : f32
    %69 = vector.broadcast %cst_33 : f32 to vector<8x32xf32>
    %70 = arith.addf %69, %68 : vector<8x32xf32>
    %71 = arith.divf %69, %70 : vector<8x32xf32>
    %72 = arith.mulf %71, %58 : vector<8x32xf32>
    %73 = arith.addf %3, %54 : vector<8x8xf32>
    %74 = tpu.concatenate %72, %54, %73 in 1 : vector<8x32xf32>, vector<8x8xf32>, vector<8x8xf32> -> vector<8x48xf32>
    %c0_34 = arith.constant 0 : index
    %c0_35 = arith.constant 0 : index
    %75 = vector.load %arg13[%c0_34, %c0_35] : memref<8x48xf32, #tpu.memory_space<vmem>>, vector<8x48xf32>
    tpu.vector_store %arg13[%c0_34, %c0_35], %74 {strides = array<i32>} : memref<8x48xf32, #tpu.memory_space<vmem>>, vector<8x48xf32>,
    return
  }
  func.func @transform_0(%arg0: i32) -> (i32, i32, i32) {
    %c0_i32 = arith.constant 0 : i32
    %c0_i32_0 = arith.constant 0 : i32
    %c0_i32_1 = arith.constant 0 : i32
    return %arg0, %c0_i32, %c0_i32_0 : i32, i32, i32
  }
  func.func @transform_1(%arg0: i32) -> (i32, i32) {
    %c0_i32 = arith.constant 0 : i32
    %c0_i32_0 = arith.constant 0 : i32
    return %arg0, %c0_i32 : i32, i32
  }
  func.func @transform_2(%arg0: i32) -> (i32, i32) {
    %c0_i32 = arith.constant 0 : i32
    %c0_i32_0 = arith.constant 0 : i32
    return %arg0, %c0_i32 : i32, i32
  }
  func.func @transform_3(%arg0: i32) -> (i32, i32) {
    %c0_i32 = arith.constant 0 : i32
    %c0_i32_0 = arith.constant 0 : i32
    return %arg0, %c0_i32 : i32, i32
  }
  func.func @transform_4(%arg0: i32) -> (i32, i32) {
    %c0_i32 = arith.constant 0 : i32
    %c0_i32_0 = arith.constant 0 : i32
    %c0_i32_1 = arith.constant 0 : i32
    return %c0_i32, %c0_i32_0 : i32, i32
  }
  func.func @transform_5(%arg0: i32) -> (i32, i32) {
    %c0_i32 = arith.constant 0 : i32
    %c0_i32_0 = arith.constant 0 : i32
    %c0_i32_1 = arith.constant 0 : i32
    return %c0_i32, %c0_i32_0 : i32, i32
  }
  func.func @transform_6(%arg0: i32) -> (i32, i32) {
    %c0_i32 = arith.constant 0 : i32
    %c0_i32_0 = arith.constant 0 : i32
    %c0_i32_1 = arith.constant 0 : i32
    return %c0_i32, %c0_i32_0 : i32, i32
  }
  func.func @transform_7(%arg0: i32) -> (i32, i32) {
    %c0_i32 = arith.constant 0 : i32
    %c0_i32_0 = arith.constant 0 : i32
    %c0_i32_1 = arith.constant 0 : i32
    return %c0_i32, %c0_i32_0 : i32, i32
  }
  func.func @transform_8(%arg0: i32) -> (i32, i32) {
    %c0_i32 = arith.constant 0 : i32
    %c0_i32_0 = arith.constant 0 : i32
    %c0_i32_1 = arith.constant 0 : i32
    return %c0_i32, %c0_i32_0 : i32, i32
  }
  func.func @transform_9(%arg0: i32) -> (i32, i32) {
    %c0_i32 = arith.constant 0 : i32
    %c0_i32_0 = arith.constant 0 : i32
    %c0_i32_1 = arith.constant 0 : i32
    return %c0_i32, %c0_i32_0 : i32, i32
  }
  func.func @transform_10(%arg0: i32) -> (i32, i32) {
    %c0_i32 = arith.constant 0 : i32
    %c0_i32_0 = arith.constant 0 : i32
    %c0_i32_1 = arith.constant 0 : i32
    return %c0_i32, %c0_i32_0 : i32, i32
  }
  func.func @transform_11(%arg0: i32) -> (i32, i32) {
    %c0_i32 = arith.constant 0 : i32
    %c0_i32_0 = arith.constant 0 : i32
    %c0_i32_1 = arith.constant 0 : i32
    return %c0_i32, %c0_i32_0 : i32, i32
  }
  func.func @transform_12(%arg0: i32) -> (i32, i32) {
    %c0_i32 = arith.constant 0 : i32
    %c0_i32_0 = arith.constant 0 : i32
    return %arg0, %c0_i32 : i32, i32
  }
}

</mosaic_0001>

<bundles_post_ra>
// kernel: tpu_custom_call.1
= control target key start
LH: loop header
LB: loop body
LE: loop exit
PB: predicated region body
PF: predicated region fallthrough
CT: control target
= control target key end

     0   :  { %s2804_s0 = inlined_call_operand.hbm [shape: f32[16,8,32], index: 0, kind: input, shape index: {}]   ;;  %s2805_s1 = inlined_call_operand.hbm [shape: f32[16,32], index: 1, kind: input, shape index: {}]   ;;  %s2806_s2 = inlined_call_operand.vmem [shape: f32[16,8], index: 2, kind: input, shape index: {}]   ;;  %s2807_s3 = inlined_call_operand.vmem [shape: f32[16,8], index: 3, kind: input, shape index: {}]   ;;  %s2808_s4 = inlined_call_operand.vmem [shape: f32[32,32], index: 4, kind: input, shape index: {}]   ;;  %s2809_s5 = inlined_call_operand.hbm [shape: f32[32,64], index: 5, kind: input, shape index: {}]   ;;  %s2810_s6 = inlined_call_operand.hbm [shape: f32[1,32], index: 6, kind: input, shape index: {}]   ;;  %s2811_s7 = inlined_call_operand.hbm [shape: f32[32,32], index: 7, kind: input, shape index: {}]   ;;  %s2812_s8 = inlined_call_operand.hbm [shape: f32[1,32], index: 8, kind: input, shape index: {}]   ;;  %s2813_s9 = inlined_call_operand.hbm [shape: f32[1,32], index: 9, kind: input, shape index: {}]   ;;  %s2814_s10 = inlined_call_operand.vmem [shape: f32[32,32], index: 10, kind: input, shape index: {}]   ;;  %s2815_s11 = inlined_call_operand.vmem [shape: f32[1,32], index: 11, kind: input, shape index: {}]   ;;  %s2816_s12 = inlined_call_operand.hbm [shape: f32[16,48], index: 12, kind: output, shape index: {}]  }
   0x1   :  { %2828 = sst [smem:[#allocation24_spill]] %s2804_s0 }
   0x2   :  { %2829 = sst [smem:[#allocation25_spill]] %s2809_s5 }
   0x3   :  { %2830 = sst [smem:[#allocation26_spill]] %s2810_s6 }
   0x4   :  { %2831 = sst [smem:[#allocation27_spill]] %s2811_s7 }
   0x5   :  { %2832 = sst [smem:[#allocation28_spill]] %s2812_s8 }
   0x6   :  { %2833 = sst [smem:[#allocation29_spill]] %s2813_s9 }
   0x7   :  { %2834 = sst [smem:[#allocation30_spill]] %s2816_s12 }
   0x8   :  { %17 = vsyncpa [#allocation3], 0 }
   0x9   :  { %19 = vsyncpa [#allocation3 + $0x1], 0 }
   0xa   :  { %20 = vsyncpa [#allocation6], 0 }
   0xb   :  { %22 = vsyncpa [#allocation6 + $0x1], 0 }
   0xc   :  { %23 = vsyncpa [#allocation9], 0 }
   0xd   :  { %24 = vsyncpa [#allocation12], 0 }
   0xe   :  { %25 = vsyncpa [#allocation4], 0 }
   0xf   :  { %27 = vsyncpa [#allocation4 + $0x1], 0  ;;  %s2312_s21 = smov 0   ;;  %s2314_s22 = smov 0  }
  0x10   :  { %s2316_s23 = smov 0   ;;  %s2318_s24 = smov 0  }
  0x11 LB: > { %2835 = sst [smem:[#allocation21_spill]] %s2225_s23  ;;  %s2231_s25 = smov [#allocation7]   ;;  %s2229_s24 = sphi %s2318_s24, %s2867_s24   ;;  %s2225_s23 = sphi %s2316_s23, %s2869_s23   ;;  %s2221_s22 = sphi %s2314_s22, %s2871_s22   ;;  %s2217_s21 = sphi %s2312_s21, %s2870_s21  }
  0x12   : > { %s351_s26 = sshll.u32 %s2231_s25, 4  ;;  %s2333_s27 = sadd.s32 4294967295, %s2229_s24   ;;  %s352_s26 = int_to_ptr.vmem [resolvable:$true] %s351_s26 }
  0x13   : > { %p1666_p0 = scmp.ge.s32.totalorder %s2229_s24, 1  ;;  %p2821_p1 = scmp.eq.s32.totalorder %s2333_s27, 0 }
  0x14   : > { %p336_p2 = scmp.lt.s32.totalorder %s2229_s24, 3  ;;  %s2232_s29 = smov [#allocation8]  }
  0x15   : > { %s365_s30 = sshll.u32 %s2232_s29, 4  ;;  %s2233_s14 = smov [#allocation11]   ;;  %s366_s30 = int_to_ptr.vmem [resolvable:$true] %s365_s30 }
  0x16   : > { %p2338_p3 = pnand %p1666_p0, %p336_p2  ;;  %s389_s15 = sshll.u32 %s2233_s14, 4  ;;  %s2351_s15 = int_to_ptr.vmem [resolvable:$true] %s389_s15 }
  0x17   : > { %s1974_s17 = scalar_lea.vmem %s352_s26, 512  ;;  %p1982_p11 = scmp.lt.s32.totalorder %s352_s26, %s352_s26 }
  0x18   : > { %s2836_s28 = scalar_select %p2338_p3, 1, 0 }
  0x19   : > { %p1839_p5 = pneg %p2338_p3  ;;  %p1975_p8 = scmp.ne.s32.totalorder %s352_s26, %s1974_s17 }
  0x1a   : > { %p1983_p12 = scmp.lt.s32.totalorder %s1974_s17, %s1974_s17 }
  0x1b   : > { %p2347_p6 = pnand %p1839_p5, %p2821_p1 }
  0x1c   : > { %p1984_p13 = por %p1983_p12, %p1982_p11 }
  0x1d   : > { %p2355_p7 = pneg %p2347_p6 }
  0x1f   : > { %p1977_p9 = pnand %p1975_p8, %p2355_p7 }
  0x21   : > { %p1978_p10 = pneg %p1977_p9 }
  0x23   : > { %p1985_p0 = pnand %p1984_p13, %p1978_p10 }
  0x25   : > { %1988 = shalt.err (!%p1985_p0)
}
  0x26   : > { %s2818_s18 = smov 128   ;;  %s2820_s19 = smov 8  }
  0x27   : > { %s2839_s5 = sld [smem:[#allocation25_spill]]  ;;  %s2000_s29 = scalar_lea.vmem %s366_s30, 16 }
  0x28   : > { %p2001_p2 = scmp.ne.s32.totalorder %s366_s30, %s2000_s29  ;;  %s2007_s14 = scalar_lea.vmem %s366_s30, 32 }
  0x29   : > { %p2008_p9 = scmp.lt.s32.totalorder %s366_s30, %s366_s30  ;;  %p2009_p10 = scmp.lt.s32.totalorder %s2007_s14, %s2000_s29 }
  0x2a   : > { %p2003_p5 = pnand %p2001_p2, %p2355_p7 }
  0x2b   : > { %p2010_p11 = por %p2009_p10, %p2008_p9 }
  0x2c   : > { %p2004_p8 = pneg %p2003_p5 }
  0x2d   : > { %1842 = dma.hbm_to_vmem [thread:$0]  (!%p2347_p6), %s2839_s5, 512, %s352_s26, [#allocation6], %s2818_s18, %s2818_s18, %s2820_s19  }
  0x2e   : > { %p2011_p12 = pnand %p2010_p11, %p2004_p8 }
  0x30   : > { %2014 = shalt.err (!%p2011_p12)
}
  0x31   : > { %s2840_s6 = sld [smem:[#allocation26_spill]]  ;;  %s2026_s26 = scalar_lea.vmem %s2351_s15, 16 }
  0x32   : > { %p2027_p13 = scmp.ne.s32.totalorder %s2351_s15, %s2026_s26  ;;  %s2033_s20 = scalar_lea.vmem %s2351_s15, 32 }
  0x33   : > { %p2034_p5 = scmp.lt.s32.totalorder %s2351_s15, %s2351_s15  ;;  %p2035_p8 = scmp.lt.s32.totalorder %s2033_s20, %s2026_s26 }
  0x34   : > { %p2029_p0 = pnand %p2027_p13, %p2355_p7 }
  0x35   : > { %p2036_p9 = por %p2035_p8, %p2034_p5 }
  0x36   : > { %p2030_p2 = pneg %p2029_p0 }
  0x37   : > { %1845 = dma.hbm_to_vmem [thread:$0]  (!%p2347_p6), %s2840_s6, 16, %s366_s30, [#allocation9]  }
  0x38   : > { %p2037_p10 = pnand %p2036_p9, %p2030_p2 }
  0x3a   : > { %2040 = shalt.err (!%p2037_p10)
}
  0x3b   : > { %s2841_s8 = sld [smem:[#allocation28_spill]]  ;;  %s2236_s30 = smov [#allocation10]  }
  0x3c   : > { %s375_s29 = sshll.u32 %s2236_s30, 4  ;;  %s2237_s14 = smov [#allocation13]   ;;  %s376_s29 = int_to_ptr.vmem [resolvable:$true] %s375_s29 }
  0x3d   : > { %s400_s17 = sshll.u32 %s2237_s14, 4  ;;  %s2052_s18 = scalar_lea.vmem %s376_s29, 512  ;;  %s401_s17 = int_to_ptr.vmem [resolvable:$true] %s400_s17 }
  0x3e   : > { %p2053_p11 = scmp.ne.s32.totalorder %s376_s29, %s2052_s18  ;;  %p2060_p0 = scmp.lt.s32.totalorder %s376_s29, %s376_s29 }
  0x3f   : > { %p2061_p2 = scmp.lt.s32.totalorder %s2052_s18, %s2052_s18 }
  0x40   : > { %p2055_p12 = pnand %p2053_p11, %p2355_p7 }
  0x41   : > { %1851 = dma.hbm_to_vmem [thread:$0]  (!%p2347_p6), %s2841_s8, 16, %s2351_s15, [#allocation12]  }
  0x42   : > { %p2056_p13 = pneg %p2055_p12  ;;  %p2062_p5 = por %p2061_p2, %p2060_p0 }
  0x44   : > { %p2063_p8 = pnand %p2062_p5, %p2056_p13 }
  0x46   : > { %2066 = shalt.err (!%p2063_p8)
}
  0x47   : > { %s2842_s26 = smov 128   ;;  %s2843_s7 = sld [smem:[#allocation27_spill]] }
  0x48   : > { %s2078_s12 = scalar_lea.vmem %s401_s17, 16  ;;  %s2085_s18 = scalar_lea.vmem %s401_s17, 32 }
  0x49   : > { %p2079_p9 = scmp.ne.s32.totalorder %s401_s17, %s2078_s12  ;;  %p2086_p12 = scmp.lt.s32.totalorder %s401_s17, %s401_s17 }
  0x4a   : > { %p2087_p13 = scmp.lt.s32.totalorder %s2085_s18, %s2078_s12 }
  0x4b   : > { %p2081_p10 = pnand %p2079_p9, %p2355_p7 }
  0x4c   : > { %p2088_p0 = por %p2087_p13, %p2086_p12 }
  0x4d   : > { %1848 = dma.hbm_to_vmem [thread:$0]  (!%p2347_p6), %s2843_s7, 512, %s376_s29, [#allocation9], %s2842_s26, %s2842_s26, %s2820_s19  }
  0x4e   : > { %p2082_p11 = pneg %p2081_p10 }
  0x50   : > { %p2089_p2 = pnand %p2088_p0, %p2082_p11 }
  0x52   : > { %2092 = shalt.err (!%p2089_p2)
}
  0x53   : > { %s2844_s9 = sld [smem:[#allocation29_spill]]  ;;  %s1665_s16 = sadd.s32 4294967294, %s2229_s24  }
  0x54   : > { %s2408_s13 = sadd.s32 1, %s2229_s24   ;;  %s40_s29 = sadd.s32 1, %s2225_s23 }
  0x55   : > { %2845 = sst [smem:[#allocation22_spill]] %s2408_s13  ;;  %s37_s14 = ssub.s32 %s2229_s24, %s2408_s13 }
  0x56   : > { %p47_p7 = scmp.ne.s32.totalorder %s2225_s23, %s2221_s22  ;;  %p38_p5 = scmp.eq.s32.totalorder %s37_s14, 0 }
  0x57   : > { %p48_p8 = scmp.eq.s32.totalorder %s2229_s24, 0  ;;  %p53_p9 = scmp.ne.s32.totalorder %s2221_s22, %s2217_s21 }
  0x58   : > { %p323_p10 = scmp.eq.s32.totalorder %s2333_s27, 1  ;;  %p329_p13 = scmp.eq.s32.totalorder %s1665_s16, 1 }
  0x59   : > { %1854 = dma.hbm_to_vmem [thread:$0]  (!%p2347_p6), %s2844_s9, 16, %s401_s17, [#allocation12]  }
  0x5a   : > { %s2420_s15 = scalar_select %p38_p5, %s2225_s23, %s40_s29  }
  0x5b   : > { %p49_p11 = por %p48_p8, %p47_p7  ;;  %p2424_p12 = por %p2821_p1, %p53_p9 }
  0x5c   : > { %2846 = sst [smem:[#allocation23_spill]] %s2420_s15  ;;  %p2428_p6 = por %p323_p10, %p47_p7 }
  0x5d   : > { %s2847_s17 = scalar_select %p2424_p12, 1, 0 }
  0x5e   : > { %s2848_s20 = scalar_select %p2428_p6, 1, 0 }
  0x5f   : > { %p1871_p0 = scmp.lt.s32.totalorder %s2229_s24, 2  ;;  %s2434_s12 = sand.u32 1, %s2225_s23  }
  0x60   : > { %p2436_p2 = por %p329_p13, %p53_p9  ;;  %s1673_s25 = sshll.u32 %s2434_s12, 6 }
  0x61   : > { %s1716_s30 = sshll.u32 %s2229_s24, 10  ;;  %s2850_s0 = sld [smem:[#allocation24_spill]] }
  0x62   : > { %s2849_s18 = scalar_select %p2436_p2, 1, 0 }
  0x63   : > { %s421_s16 = scalar_lea.vmem [#allocation2], %s1673_s25  ;;  %p2447_p7 = pnand %p1871_p0, %p49_p11 }
  0x64   : > { %s428_s5 = sshll.u32 %s421_s16, 4  ;;  %s2451_s5 = int_to_ptr.vmem [resolvable:$true] %s428_s5 }
  0x65   : > { %p2095_p8 = pneg %p2447_p7 }
  0x67   : > { %s2445_s19 = scalar_lea.hbm %s2850_s0, %s1716_s30  ;;  %s2098_s29 = scalar_lea.hbm %s2850_s0, 2048 }
  0x68   : > { %s2093_s9 = scalar_lea.hbm %s2445_s19, 1024  ;;  %p2099_p11 = scmp.lt.s32.totalorder %s2445_s19, %s2850_s0 }
  0x69   : > { %p2094_p5 = scmp.ne.s32.totalorder %s2445_s19, %s2093_s9  ;;  %p2100_p13 = scmp.lt.s32.totalorder %s2098_s29, %s2093_s9 }
  0x6b   : > { %p2096_p9 = pnand %p2095_p8, %p2094_p5  ;;  %p2101_p0 = por %p2100_p13, %p2099_p11 }
  0x6d   : > { %p2097_p10 = pneg %p2096_p9 }
  0x6f   : > { %p2102_p4 = pnand %p2101_p0, %p2097_p10 }
  0x71   : > { %2105 = shalt.err (!%p2102_p4)
}
  0x72   : > { %s2106_s7 = scalar_lea.vmem %s2451_s5, 1024  ;;  %s2238_s25 = smov [#allocation2]  }
  0x73   : > { %p2107_p1 = scmp.ne.s32.totalorder %s2451_s5, %s2106_s7  ;;  %s2111_s30 = sshll.u32 %s2238_s25, 4  ;;  %s2112_s30 = int_to_ptr.vmem [resolvable:$false] %s2111_s30 }
  0x74   : > { %s2113_s8 = scalar_lea.vmem %s2112_s30, 2048  ;;  %p2114_p2 = scmp.lt.s32.totalorder %s2451_s5, %s2112_s30 }
  0x75   : > { %p2109_p5 = pnand %p2107_p1, %p2095_p8  ;;  %p2115_p6 = scmp.lt.s32.totalorder %s2113_s8, %s2106_s7 }
  0x77   : > { %p2110_p9 = pneg %p2109_p5  ;;  %p2116_p12 = por %p2115_p6, %p2114_p2 }
  0x79   : > { %p2117_p11 = pnand %p2116_p12, %p2110_p9 }
  0x7b   : > { %2120 = shalt.err (!%p2117_p11)
}
  0x7c   : > { %s2852_s9 = smov 8   ;;  %s2853_s29 = scalar_lea.sflag [#allocation3], %s2434_s12 }
  0x7d   : > { %1858 = dma.hbm_to_vmem [thread:$0]  (!%p2447_p7), %s2445_s19, 1024, %s2451_s5, %s2853_s29, %s2842_s26, %s2842_s26, %s2852_s9  }
  0x7e   : > { %s1676_s14 = sshll.u32 %s2434_s12, 3  ;;  %s1677_s16 = sshll.u32 %s2229_s24, 7 }
  0x7f   : > { %s2489_s25 = scalar_lea.hbm %s2805_s1, %s1677_s16  ;;  %s442_s30 = scalar_lea.vmem [#allocation5], %s1676_s14 }
  0x80   : > { %s449_s0 = sshll.u32 %s442_s30, 4  ;;  %s2854_s15 = sand.u32 1, %s2229_s24   ;;  %s450_s0 = int_to_ptr.vmem [resolvable:$true] %s449_s0 }
  0x81   : > { %s439_s23 = scalar_lea.sflag [#allocation6], %s2854_s15  ;;  %s2121_s13 = scalar_lea.hbm %s2489_s25, 128 }
  0x82   : > { %p2122_p1 = scmp.ne.s32.totalorder %s2489_s25, %s2121_s13  ;;  %s2126_s26 = scalar_lea.hbm %s2805_s1, 256 }
  0x83   : > { %p2127_p6 = scmp.lt.s32.totalorder %s2489_s25, %s2805_s1  ;;  %p2128_p2 = scmp.lt.s32.totalorder %s2126_s26, %s2121_s13 }
  0x84   : > { %p2124_p4 = pnand %p2122_p1, %p2095_p8 }
  0x85   : > { %p2129_p10 = por %p2128_p2, %p2127_p6 }
  0x86   : > { %p2125_p12 = pneg %p2124_p4 }
  0x88   : > { %p2130_p13 = pnand %p2129_p10, %p2125_p12 }
  0x8a   : > { %2133 = shalt.err (!%p2130_p13)
}
  0x8b   : > { %s2134_s29 = scalar_lea.vmem %s450_s0, 128  ;;  %s2239_s15 = smov [#allocation5]  }
  0x8c   : > { %p2135_p0 = scmp.ne.s32.totalorder %s450_s0, %s2134_s29  ;;  %s2139_s14 = sshll.u32 %s2239_s15, 4  ;;  %s2140_s14 = int_to_ptr.vmem [resolvable:$false] %s2139_s14 }
  0x8d   : > { %s2141_s16 = scalar_lea.vmem %s2140_s14, 256  ;;  %p2142_p11 = scmp.lt.s32.totalorder %s450_s0, %s2140_s14 }
  0x8e   : > { %p2137_p5 = pnand %p2135_p0, %p2095_p8  ;;  %p2143_p1 = scmp.lt.s32.totalorder %s2141_s16, %s2134_s29 }
  0x90   : > { %p2138_p9 = pneg %p2137_p5  ;;  %p2144_p4 = por %p2143_p1, %p2142_p11 }
  0x92   : > { %p2145_p3 = pnand %p2144_p4, %p2138_p9 }
  0x94   : > { %2148 = shalt.err (!%p2145_p3)
}
  0x95   : > { %1861 = dma.hbm_to_vmem [thread:$0]  (!%p2447_p7), %s2489_s25, 128, %s450_s0, %s439_s23  }
  0x96   : > { %p2855_p12 = scmp.ne.s32.totalorder %s2836_s28, 0 }
  0x97   : > { %s2514_s13 = sand.u32 (!%p2855_p12), 1, %s2221_s22   ;;  %p2856_p8 = scmp.ne.s32.totalorder (!%p2855_p12), %s2847_s17, 0 }
  0x98   : > { %472 = sbr.rel (%p2855_p12) target bundleno = 1481 (0x5c9), region = 68  ;;  %s1679_s7 = sshll.u32 (!%p2855_p12), %s2514_s13, 6 }
  0x99   : > { %s475_s8 = scalar_lea.sflag (!%p2855_p12), [#allocation3], %s2514_s13  ;;  %s2518_s30 = scalar_lea.vmem (!%p2855_p12), [#allocation2], %s1679_s7 }
  0x9d   : > { %2192 = dma.done.wait (%p2856_p8), %s475_s8, 1024  }
  0x9e   : > { %2194 = vsyncadd (%p2856_p8), %s475_s8, 4294966272  ;;  %s483_s0 = sand.u32 1, %s2333_s27   ;;  %s1680_s6 = sshll.u32 %s2514_s13, 3 }
  0x9f   : > { %s484_s23 = scalar_lea.sflag [#allocation6], %s483_s0  ;;  %s2528_s28 = scalar_lea.vmem [#allocation5], %s1680_s6 }
  0xa0   : > { %2196 = dma.done.wait (%p2856_p8), %s484_s23, 128  }
  0xa1   : > { %2198 = vsyncadd (%p2856_p8), %s484_s23, 4294967168  ;;  %p2857_p3 = scmp.eq.s32.totalorder %s2333_s27, 0 }
  0xa3   : > { %2200 = dma.done.wait (%p2857_p3), [#allocation6], 512   ;;  %p2858_p7 = pmov %p2857_p3 }
  0xa4   : > { %p2859_p6 = pmov %p2857_p3 }
  0xa5   : > { %2202 = vsyncadd (%p2858_p7), [#allocation6], 4294966784 }
  0xa6   : > { %2204 = dma.done.wait (%p2859_p6), [#allocation9], 528   ;;  %p2860_p2 = pmov %p2857_p3 }
  0xa8   : > { %2206 = vsyncadd (%p2860_p2), [#allocation9], 4294966768  ;;  %p2861_p10 = pmov %p2860_p2 }
  0xa9   : > { %p2862_p13 = pmov %p2860_p2 }
  0xaa   : > { %2208 = dma.done.wait (%p2861_p10), [#allocation12], 32  }
  0xab   : > { %2210 = vsyncadd (%p2862_p13), [#allocation12], 4294967264  ;;  %p562_p0 = scmp.lt.s32.totalorder %s2333_s27, 1  ;;  %v2240_v0 = vmov 0.0   ;;  %vm2241_vm0 = vmmov 0   ;;  %v798_v1 = vlaneseq  ;;  %v584_v3 = vld [vmem:[%s2808_s4 + $0x18] sm:$0xff] }
  0xac   : > { %1771 = vmatprep.subr.mxu1 %v2240_v0  ;;  %1779 = vmatprep.mubr.msk.f32.mxu1 %vm2241_vm0, %v2240_v0  ;;  %v718_v4 = vld [vmem:[#allocation7 + $0x18] sm:$0xff]  ;;  %v583_v5 = vld [vmem:[%s2808_s4 + $0x10] sm:$0xff]  ;;  %v717_v6 = vld [vmem:[#allocation7 + $0x10] sm:$0xff]  ;;  %vm585_vm1 = vcmask 261120   ;;  %v2242_v41 = vmov 1966171168  }
  0xad   : > { %s2551_s17 = scalar_select %p562_p0, %s2333_s27, 1  ;;  %v2554_v2 = vshrl.u32 %v798_v1, 7  ;;  %1751 = vmatprep.subr.mxu0 %v584_v3  ;;  %1772 = vmatpush3.msra.mxu1 %v718_v4  ;;  %v582_v7 = vld [vmem:[%s2808_s4 + $0x8] sm:$0xff]  ;;  %v716_v8 = vld [vmem:[#allocation7 + $0x8] sm:$0xff]  ;;  %v581_v11 = vld [vmem:[%s2808_s4] sm:$0xff]  ;;  %v796_v42 = vunpack.c.l.s4 %v2242_v41  ;;  %vm1215_vm2 = vcmask 1041409  }
  0xae   : > { %1752 = vmatpush3.msra.mxu0 %v584_v3  ;;  %1773 = vmatprep.subr.mxu1 %v2240_v0  ;;  %v715_v12 = vld [vmem:[#allocation7] sm:$0xff]  ;;  %v2581_v13 = vld [vmem:[%s2518_s30] sm:$0xff]  ;;  %v2588_v16 = vld [vmem:[%s2518_s30 + $0x8] sm:$0xff]  ;;  %vm1217_vm3 = vcmask 1042434   ;;  %vm1219_vm4 = vcmask 1043459   ;;  %vm1221_vm5 = vcmask 1044484  }
  0xaf   : > { %s1687_s25 = sshll.u32 %s2551_s17, 3  ;;  %v907_v9 = vsub.s32 2, %v2554_v2  ;;  %1753 = vmatprep.subr.mxu0 %v583_v5  ;;  %1774 = vmatpush3.msra.mxu1 %v717_v6  ;;  %v2574_v10 = vsub.s32 0, %v2554_v2  ;;  %v578_v15 = vld [vmem:[%s2528_s28] sm:$0xff]  ;;  %v914_v18 = vsub.s32 3, %v2554_v2  ;;  %v2595_v19 = vld [vmem:[%s2518_s30 + $0x10] sm:$0xff]  ;;  %v797_v43 = vunpack.c.0.s8 %v796_v42 }
  0xb0   : > { %s569_s16 = scalar_lea.vmem %s2807_s3, %s1687_s25  ;;  %1754 = vmatpush3.msra.mxu0 %v583_v5  ;;  %1775 = vmatprep.subr.mxu1 %v2240_v0  ;;  %v900_v21 = vsub.s32 1, %v2554_v2  ;;  %v2608_v22 = vld [vmem:[%s2518_s30 + $0x18] sm:$0xff]  ;;  %v928_v24 = vsub.s32 5, %v2554_v2  ;;  %v2615_v25 = vld [vmem:[%s2518_s30 + $0x20] sm:$0xff]  ;;  %v921_v27 = vsub.s32 4, %v2554_v2  ;;  %v2627_v28 = vld [vmem:[%s2518_s30 + $0x28] sm:$0xff]  ;;  %s565_s23 = scalar_lea.vmem %s2806_s2, %s1687_s25 }
  0xb1   : > { %1755 = vmatprep.subr.mxu0 %v582_v7  ;;  %1776 = vmatpush3.msra.mxu1 %v716_v8  ;;  %v2583_v14 = vld [vmem:[%s569_s16] sm:$0xff]  ;;  %v942_v30 = vsub.s32 7, %v2554_v2  ;;  %v2634_v31 = vld [vmem:[%s2518_s30 + $0x30] sm:$0xff]  ;;  %v935_v33 = vsub.s32 6, %v2554_v2  ;;  %v2645_v34 = vld [vmem:[%s2518_s30 + $0x38] sm:$0xff]  ;;  %v800_v46 = vsub.s32 %v797_v43, %v2554_v2  ;;  %vm1223_vm6 = vcmask 1045509  }
  0xb2   : > { %1756 = vmatpush3.msra.mxu0 %v582_v7  ;;  %1777 = vmatprep.subr.mxu1 %v2240_v0  ;;  %v908_v17 = vrot.slane %v2583_v14, %v907_v9  ;;  %v894_v20 = vrot.slane %v2583_v14, %v2574_v10  ;;  %v915_v23 = vrot.slane %v2583_v14, %v914_v18  ;;  %v980_v37 = vld [vmem:[#allocation10 + $0x18] sm:$0xff]  ;;  %v979_v38 = vld [vmem:[#allocation10 + $0x10] sm:$0xff]  ;;  %v978_v39 = vld [vmem:[#allocation10 + $0x8] sm:$0xff]  ;;  %vm1225_vm7 = vcmask 1046534   ;;  %s2243_s28 = smov 96   ;;  %s2244_s26 = smov 40  }
  0xb3   : > { %1757 = vmatprep.subr.mxu0 %v581_v11  ;;  %1778 = vmatpush3.msra.mxu1 %v715_v12  ;;  %v901_v26 = vrot.slane %v2583_v14, %v900_v21  ;;  %v929_v29 = vrot.slane %v2583_v14, %v928_v24  ;;  %v922_v32 = vrot.slane %v2583_v14, %v921_v27  ;;  %v977_v40 = vld [vmem:[#allocation10] sm:$0xff]  ;;  %v1698_v57 = vld [vmem:[#allocation8] ss:$0 sm:$0xff]  ;;  %vm1227_vm8 = vcmask 1047559   ;;  %s2245_s14 = smov 32   ;;  %s1713_s8 = sshll.u32 %s2333_s27, 7 }
  0xb4   : > { %1758 = vmatpush3.msra.mxu0 %v581_v11  ;;  %1759 = vmatprep.mubr.msk.f32.mxu0 %vm585_vm1, %v2581_v13  ;;  %v943_v35 = vrot.slane %v2583_v14, %v942_v30  ;;  %v936_v36 = vrot.slane %v2583_v14, %v935_v33  ;;  %vm1231_vm10 = vcmask 64512   ;;  %s560_s30 = scalar_lea.vmem [#allocation14], %s1680_s6  ;;  %vm1483_vm11 = vcmask 326656   ;;  %s2863_s17 = sld [smem:[#allocation30_spill]] }
  0xb5   : > { %1780 = vmatmul.mubr.msk.f32.vlgmr.msra.gmra.mxu1 %vm585_vm1, %v578_v15  ;;  %1760 = vmatmul.mubr.msk.f32.vlgmr.msra.gmra.mxu0 %vm585_vm1, %v2588_v16  ;;  %s1501_s0 = sshll.u32 %s560_s30, 4  ;;  %vm1485_vm12 = vcmask 392192   ;;  %s1488_s27 = scalar_lea.sflag [#allocation4], %s2514_s13  ;;  %s1502_s0 = int_to_ptr.vmem [resolvable:$true] %s1501_s0 }
  0xb6   : > { %1762 = vmatprep.mubr.msk.f32.mxu0 %vm585_vm1, %v2595_v19  ;;  %910 = vbcast.lane.b32.xlu1 %v908_v17, 256  ;;  %s2149_s5 = scalar_lea.vmem %s1502_s0, 128  ;;  %p2864_p9 = scmp.ne.s32.totalorder %s2848_s20, 0 }
  0xb7   : > { %896 = vbcast.lane.b32.xlu0 %v894_v20, 256  ;;  %1802 = vmatprep.subr.mxu0 %v2240_v0  ;;  %p2150_p5 = scmp.ne.s32.totalorder %s1502_s0, %s2149_s5  ;;  %s2246_s6 = smov [#allocation14]  }
  0xb8   : > { %1782 = vmatprep.subr.mxu1 %v980_v37  ;;  %s2153_s19 = sshll.u32 %s2246_s6, 4  ;;  %s2154_s19 = int_to_ptr.vmem [resolvable:$false] %s2153_s19 }
  0xb9   : > { %1763 = vmatmul.mubr.msk.f32.gmra.mxu0 %vm585_vm1, %v2608_v22  ;;  %1783 = vmatpush3.msra.mxu1 %v980_v37  ;;  %p2151_p11 = pnand %p2150_p5, %p2864_p9  ;;  %p2156_p4 = scmp.lt.s32.totalorder %s1502_s0, %s2154_s19 }
  0xba   : > { %1765 = vmatprep.mubr.msk.f32.mxu0 %vm585_vm1, %v2615_v25  ;;  %917 = vbcast.lane.b32.xlu1 %v915_v23, 256  ;;  %s2767_s25 = scalar_lea.hbm %s2863_s17, %s1713_s8 }
  0xbb   : > { %903 = vbcast.lane.b32.xlu0 %v901_v26, 256  ;;  %1784 = vmatprep.subr.mxu1 %v979_v38  ;;  %p2152_p1 = pneg %p2151_p11 }
  0xbc   : > { %1785 = vmatpush3.msra.mxu1 %v979_v38 }
  0xbd   : > { %1766 = vmatmul.mubr.msk.f32.gmra.mxu0 %vm585_vm1, %v2627_v28  ;;  %1786 = vmatprep.subr.mxu1 %v978_v39 }
  0xbe   : > { %1768 = vmatprep.mubr.msk.f32.mxu0 %vm585_vm1, %v2634_v31  ;;  %931 = vbcast.lane.b32.xlu1 %v929_v29, 256 }
  0xbf   : > { %924 = vbcast.lane.b32.xlu0 %v922_v32, 256  ;;  %1787 = vmatpush3.msra.mxu1 %v978_v39 }
  0xc0   : > { %1788 = vmatprep.subr.mxu1 %v977_v40 }
  0xc1   : > { %1769 = vmatmul.mubr.msk.f32.gmra.mxu0 %vm585_vm1, %v2645_v34  ;;  %1789 = vmatpush3.msra.mxu1 %v977_v40 }
  0xc2   : > { %945 = vbcast.lane.b32.xlu1 %v943_v35, 256  ;;  %1810 = vmatprep.mubr.msk.f32.mxu0 %vm2241_vm0, %v2240_v0 }
  0xc3   : > { %938 = vbcast.lane.b32.xlu0 %v936_v36, 256 }
 0x128   : > { %v911_v45 = vpop.permute.xlu1 %910 }
 0x129   : > { %v897_v44 = vpop.permute.xlu0 %896  ;;  %v955_v4 = vmul.f32 %v1698_v57, %v911_v45 }
 0x12a   : > { %v953_v5 = vmul.f32 %v1698_v57, %v897_v44 }
 0x12c   : > { %v918_v52 = vpop.permute.xlu1 %917 }
 0x12d   : > { %v904_v47 = vpop.permute.xlu0 %903  ;;  %v956_v20 = vmul.f32 %v1698_v57, %v918_v52 }
 0x12e   : > { %v954_v6 = vmul.f32 %v1698_v57, %v904_v47 }
 0x130   : > { %v932_v23 = vpop.permute.xlu1 %931 }
 0x131   : > { %v925_v3 = vpop.permute.xlu0 %924 }
 0x132   : > { %v957_v40 = vmul.f32 %v1698_v57, %v925_v3 }
 0x175   : > { %v2658_v48 = vpop.f32.mrf.mxu1  ;;  %v1761_v49 = vpop.f32.mrf.mxu0 }
 0x176   : > { %v794_v50 = vcombine.high %v2658_v48, %v2658_v48  ;;  %v801_v51 = vrot.slane %v2658_v48, %v800_v46 }
 0x177   : > { %v1781_v53 = vpop.f32.mrf.mxu1  ;;  %v676_v54 = vpop.f32.mrf.mxu0 }
 0x178   : > { %v808_v55 = vrot.slane %v794_v50, %v800_v46  ;;  %v809_v56 = vcombine.high %v801_v51, %v801_v51  ;;  %v817_v58 = vrot.slane %v801_v51, %v800_v46  ;;  %v939_v50 = vpop.permute.xlu0 %938  ;;  %v958_v51 = vmul.f32 %v1698_v57, %v932_v23 }
 0x179   : > { %v1764_v59 = vpop.f32.mrf.mxu0 }
 0x17a   : > { %v831_v60 = vrot.slane %v809_v56, %v800_v46  ;;  %v846_v61 = vrot.slane %v817_v58, %v2574_v10  ;;  %v839_v62 = vcombine.high %v817_v58, %v817_v58  ;;  %v810_v63 = vcombine.high %v808_v55, %v808_v55  ;;  %v946_v58 = vpop.permute.xlu1 %945 }
 0x17b   : > { %v686_v7 = vpop.f32.mrf.mxu0  ;;  %v824_v8 = vrot.slane %v808_v55, %v800_v46 }
 0x17c   : > { %v850_v11 = vrot.slane %v831_v60, %v2574_v10  ;;  %v883_v12 = vadd.f32 %v846_v61, %v676_v54  ;;  %v841_v15 = vcombine.high %v831_v60, %v831_v60  ;;  %v854_v17 = vrot.slane %v839_v62, %v2574_v10 }
 0x17d   : > { %v1767_v26 = vpop.f32.mrf.mxu0  ;;  %v838_v29 = vrot.slane %v810_v63, %v800_v46  ;;  %v840_v32 = vcombine.high %v824_v8, %v824_v8  ;;  %v862_v42 = vrot.slane %v824_v8, %v2574_v10  ;;  %v959_v60 = vmul.f32 %v1698_v57, %v939_v50 }
 0x17e   : > { %v884_v35 = vadd.f32 %v1761_v49, %v850_v11  ;;  %v961_v36 = vadd.f32 %v953_v5, %v883_v12  ;;  %v858_v37 = vrot.slane %v841_v15, %v2574_v10  ;;  %v885_v38 = vadd.f32 %v854_v17, %v686_v7 }
 0x17f   : > { %v866_v39 = vrot.slane %v838_v29, %v2574_v10  ;;  %v696_v41 = vpop.f32.mrf.mxu0  ;;  %v842_v43 = vcombine.high %v838_v29, %v838_v29  ;;  %v870_v49 = vrot.slane %v840_v32, %v2574_v10  ;;  %v960_v63 = vmul.f32 %v1698_v57, %v946_v58 }
 0x180   : > { %1923 = vtanh.f32 %v961_v36  ;;  %v886_v44 = vadd.f32 %v1764_v59, %v858_v37  ;;  %v962_v45 = vadd.f32 %v954_v6, %v884_v35  ;;  %v963_v47 = vadd.f32 %v955_v4, %v885_v38 }
 0x181   : > { %v887_v46 = vadd.f32 %v862_v42, %v696_v41  ;;  %v1770_v52 = vpop.f32.mrf.mxu0  ;;  %v888_v54 = vadd.f32 %v1767_v26, %v866_v39  ;;  %v874_v55 = vrot.slane %v842_v43, %v2574_v10 }
 0x182   : > { %v964_v53 = vadd.f32 %v956_v20, %v886_v44  ;;  %1925 = vtanh.f32 %v962_v45  ;;  %v1699_v20 = vld [vmem:[#allocation11] ss:$0 sm:$0xff] }
 0x183   : > { %1927 = vtanh.f32 %v963_v47  ;;  %v965_v56 = vadd.f32 %v957_v40, %v887_v46  ;;  %v706_v61 = vpop.f32.mrf.mxu0  ;;  %v966_v59 = vadd.f32 %v958_v51, %v888_v54  ;;  %v890_v3 = vadd.f32 %v1770_v52, %v874_v55  ;;  %v1708_v55 = vld [vmem:[#allocation13] ss:$0 sm:$0xff] }
 0x184   : > { %v889_v62 = vadd.f32 %v870_v49, %v706_v61  ;;  %1929 = vtanh.f32 %v964_v53 }
 0x185   : > { %1931 = vtanh.f32 %v965_v56  ;;  %v968_v5 = vadd.f32 %v960_v63, %v890_v3 }
 0x186   : > { %v967_v4 = vadd.f32 %v959_v60, %v889_v62  ;;  %1933 = vtanh.f32 %v966_v59 }
 0x188   : > { %1935 = vtanh.f32 %v967_v4 }
 0x189   : > { %1937 = vtanh.f32 %v968_v5 }
 0x18d   : > { %v1924_v6 = vpop.eup %1923 }
 0x18e   : > { %1790 = vmatprep.mubr.msk.f32.mxu1 %vm585_vm1, %v1924_v6 }
 0x18f   : > { %v1926_v7 = vpop.eup %1925 }
 0x190   : > { %v1928_v8 = vpop.eup %1927  ;;  %1791 = vmatmul.mubr.msk.f32.vlgmr.msra.gmra.mxu1 %vm585_vm1, %v1926_v7 }
 0x191   : > { %1793 = vmatprep.mubr.msk.f32.mxu1 %vm585_vm1, %v1928_v8  ;;  %v1930_v11 = vpop.eup %1929 }
 0x192   : > { %v1932_v12 = vpop.eup %1931 }
 0x193   : > { %v1934_v57 = vpop.eup %1933 }
 0x194   : > { %1794 = vmatmul.mubr.msk.f32.gmra.mxu1 %vm585_vm1, %v1930_v11 }
 0x195   : > { %1796 = vmatprep.mubr.msk.f32.mxu1 %vm585_vm1, %v1932_v12  ;;  %v1936_v15 = vpop.eup %1935 }
 0x196   : > { %v1938_v17 = vpop.eup %1937 }
 0x198   : > { %1797 = vmatmul.mubr.msk.f32.gmra.mxu1 %vm585_vm1, %v1934_v57 }
 0x199   : > { %1799 = vmatprep.mubr.msk.f32.mxu1 %vm585_vm1, %v1936_v15 }
 0x19c   : > { %1800 = vmatmul.mubr.msk.f32.gmra.mxu1 %vm585_vm1, %v1938_v17 }
 0x250   : > { %v1792_v23 = vpop.f32.mrf.mxu1 }
 0x251   : > { %v1084_v26 = vadd.f32 %v1792_v23, %v1699_v20 }
 0x252   : > { %v1078_v29 = vpop.f32.mrf.mxu1 }
 0x253   : > { %v1118_v32 = vadd.f32 %v1926_v7, %v1084_v26  ;;  %v1079_v35 = vadd.f32 %v1699_v20, %v1078_v29 }
 0x254   : > { %v1795_v36 = vpop.f32.mrf.mxu1 }
 0x255   : > { %1939 = vtanh.f32 %v1118_v32  ;;  %v1117_v37 = vadd.f32 %v1924_v6, %v1079_v35  ;;  %v1094_v38 = vadd.f32 %v1795_v36, %v1699_v20 }
 0x256   : > { %v1088_v39 = vpop.f32.mrf.mxu1 }
 0x257   : > { %1941 = vtanh.f32 %v1117_v37  ;;  %v1120_v40 = vadd.f32 %v1930_v11, %v1094_v38  ;;  %v1089_v41 = vadd.f32 %v1699_v20, %v1088_v39  ;;  %v1182_v37 = vand.u32 127, %v798_v1 }
 0x258   : > { %v1798_v42 = vpop.f32.mrf.mxu1 }
 0x259   : > { %1943 = vtanh.f32 %v1120_v40  ;;  %v1119_v43 = vadd.f32 %v1928_v8, %v1089_v41  ;;  %v1104_v44 = vadd.f32 %v1798_v42, %v1699_v20  ;;  %v1185_v39 = vsub.s32 %v1182_v37, %v2554_v2  ;;  %v1363_v2 = vld [vmem:[%s2814_s10] sm:$0xff] }
 0x25a   : > { %v1098_v45 = vpop.f32.mrf.mxu1 }
 0x25b   : > { %1945 = vtanh.f32 %v1119_v43  ;;  %v1122_v47 = vadd.f32 %v1934_v57, %v1104_v44  ;;  %v1099_v50 = vadd.f32 %v1699_v20, %v1098_v45 }
 0x25c   : > { %v1801_v51 = vpop.f32.mrf.mxu1 }
 0x25d   : > { %v1121_v46 = vadd.f32 %v1932_v12, %v1099_v50  ;;  %v1114_v52 = vadd.f32 %v1801_v51, %v1699_v20  ;;  %1947 = vtanh.f32 %v1122_v47 }
 0x25e   : > { %v1108_v49 = vpop.f32.mrf.mxu1 }
 0x25f   : > { %1949 = vtanh.f32 %v1121_v46  ;;  %v1124_v53 = vadd.f32 %v1938_v17, %v1114_v52  ;;  %v1109_v54 = vadd.f32 %v1699_v20, %v1108_v49 }
 0x261   : > { %v1123_v56 = vadd.f32 %v1936_v15, %v1109_v54  ;;  %1951 = vtanh.f32 %v1124_v53 }
 0x262   : > { %v1940_v58 = vpop.eup %1939 }
 0x263   : > { %1953 = vtanh.f32 %v1123_v56  ;;  %v1141_v60 = vmul.f32 %v1940_v58, %v1708_v55  ;;  %v579_v58 = vld [vmem:[%s565_s23] sm:$0xff] }
 0x264   : > { %v1942_v61 = vpop.eup %1941  ;;  %vm1172_vm9 = vcmp.eq.f32.partialorder %v579_v58, 0.0 }
 0x265   : > { %v1151_v62 = vsel %vm585_vm1, %v1141_v60, 0.0  ;;  %v1140_v59 = vmul.f32 %v1942_v61, %v1708_v55 }
 0x266   : > { %v1944_v63 = vpop.eup %1943  ;;  %1152 = vadd.xlane.f32.xlu1 %v1151_v62 }
 0x267   : > { %v1148_v3 = vsel %vm585_vm1, %v1140_v59, 0.0  ;;  %v1143_v4 = vmul.f32 %v1944_v63, %v1708_v55 }
 0x268   : > { %v1946_v5 = vpop.eup %1945  ;;  %1149 = vadd.xlane.f32.xlu0 %v1148_v3 }
 0x269   : > { %v1157_v7 = vsel %vm585_vm1, %v1143_v4, 0.0  ;;  %v1142_v8 = vmul.f32 %v1946_v5, %v1708_v55 }
 0x26a   : > { %v1948_v6 = vpop.eup %1947 }
 0x26b   : > { %v1154_v15 = vsel %vm585_vm1, %v1142_v8, 0.0  ;;  %v1145_v20 = vmul.f32 %v1948_v6, %v1708_v55 }
 0x26c   : > { %v1950_v11 = vpop.eup %1949  ;;  %1158 = vadd.xlane.f32.xlu0 %v1157_v7 }
 0x26d   : > { %v1144_v12 = vmul.f32 %v1950_v11, %v1708_v55  ;;  %v1163_v29 = vsel %vm585_vm1, %v1145_v20, 0.0 }
 0x26e   : > { %v1952_v57 = vpop.eup %1951 }
 0x26f   : > { %v1160_v17 = vsel %vm585_vm1, %v1144_v12, 0.0  ;;  %v1147_v35 = vmul.f32 %v1952_v57, %v1708_v55 }
 0x270   : > { %v1954_v23 = vpop.eup %1953  ;;  %1155 = vadd.xlane.f32.xlu0 %v1154_v15  ;;  %1161 = vadd.xlane.f32.xlu1 %v1160_v17 }
 0x271   : > { %v1146_v26 = vmul.f32 %v1954_v23, %v1708_v55  ;;  %v1169_v36 = vsel %vm585_vm1, %v1147_v35, 0.0 }
 0x273   : > { %v1166_v32 = vsel %vm585_vm1, %v1146_v26, 0.0 }
 0x274   : > { %1164 = vadd.xlane.f32.xlu0 %v1163_v29  ;;  %1167 = vadd.xlane.f32.xlu1 %v1166_v32 }
 0x278   : > { %1170 = vadd.xlane.f32.xlu0 %v1169_v36 }
 0x2ef   : > { %v1153_v40 = vpop.xlane.xlu1 %1152 }
 0x2f0   : > { %v1190_v43 = vrot.slane %v1153_v40, %v1185_v39 }
 0x2f1   : > { %v1150_v38 = vpop.xlane.xlu0 %1149 }
 0x2f2   : > { %v1186_v42 = vrot.slane %v1150_v38, %v1185_v39 }
 0x2f4   : > { %v1216_v50 = vsel %vm1215_vm2, %v1190_v43, %v1186_v42 }
 0x2f5   : > { %v1159_v41 = vpop.xlane.xlu0 %1158 }
 0x2f6   : > { %v1198_v51 = vrot.slane %v1159_v41, %v1185_v39 }
 0x2f9   : > { %v1156_v44 = vpop.xlane.xlu0 %1155  ;;  %v1162_v45 = vpop.xlane.xlu1 %1161 }
 0x2fa   : > { %v1194_v47 = vrot.slane %v1156_v44, %v1185_v39  ;;  %v1202_v46 = vrot.slane %v1162_v45, %v1185_v39 }
 0x2fc   : > { %v1218_v1 = vsel %vm1217_vm3, %v1194_v47, %v1216_v50 }
 0x2fd   : > { %v1220_v52 = vsel %vm1219_vm4, %v1198_v51, %v1218_v1  ;;  %v1165_v49 = vpop.xlane.xlu0 %1164  ;;  %v1168_v53 = vpop.xlane.xlu1 %1167 }
 0x2fe   : > { %v1222_v54 = vsel %vm1221_vm5, %v1202_v46, %v1220_v52  ;;  %v1206_v55 = vrot.slane %v1165_v49, %v1185_v39  ;;  %v1210_v56 = vrot.slane %v1168_v53, %v1185_v39 }
 0x300   : > { %v1224_v60 = vsel %vm1223_vm6, %v1206_v55, %v1222_v54 }
 0x301   : > { %v1171_v61 = vpop.xlane.xlu0 %1170  ;;  %v1226_v59 = vsel %vm1225_vm7, %v1210_v56, %v1224_v60 }
 0x302   : > { %v1214_v62 = vrot.slane %v1171_v61, %v1185_v39 }
 0x304   : > { %v1228_v63 = vsel %vm1227_vm8, %v1214_v62, %v1226_v59 }
 0x305   : > { %v1230_v3 = vsel %vm1172_vm9, -1e+09, %v1228_v63 }
 0x306   : > { %v1232_v4 = vsel %vm1231_vm10, %v1230_v3, -inf }
 0x307   : > { %1233 = vmax.xlane.f32.xlu1 %v1232_v4 }
 0x390   : > { %v1234_v5 = vpop.xlane.xlu1 %1233 }
 0x391   : > { %v1235_v6 = vsub.f32 %v1230_v3, %v1234_v5 }
 0x393   : > { %v1236_v7 = vmul.f32 1.442695, %v1235_v6 }
 0x395   : > { %1955 = vpow2.f32 %v1236_v7 }
 0x3a2   : > { %v1956_v8 = vpop.eup %1955 }
 0x3a3   : > { %v1238_v11 = vsel %vm1231_vm10, %v1956_v8, 0.0 }
 0x3a4   : > { %1239 = vadd.xlane.f32.xlu0 %v1238_v11 }
 0x42d   : > { %v1240_v12 = vpop.xlane.xlu0 %1239 }
 0x42e   : > { %1957 = vrcp.f32 %v1240_v12 }
 0x43b   : > { %v1958_v57 = vpop.eup %1957 }
 0x43c   : > { %v1242_v15 = vmul.f32 %v1958_v57, %v1956_v8 }
 0x43e   : > { %v1253_v17 = vrot.slane %v1242_v15, %v900_v21  ;;  %v1246_v20 = vrot.slane %v1242_v15, %v2574_v10  ;;  %v1274_v23 = vrot.slane %v1242_v15, %v921_v27  ;;  %v1260_v26 = vrot.slane %v1242_v15, %v907_v9  ;;  %v1366_v9 = vld [vmem:[%s2814_s10 + $0x18] sm:$0xff] }
 0x43f   : > { %v1288_v29 = vrot.slane %v1242_v15, %v935_v33  ;;  %v1267_v32 = vrot.slane %v1242_v15, %v914_v18  ;;  %v1281_v10 = vrot.slane %v1242_v15, %v928_v24  ;;  %v1473_v21 = vadd.f32 %v1242_v15, %v2583_v14  ;;  %1803 = vmatpush3.msra.mxu0 %v1366_v9  ;;  %v1365_v18 = vld [vmem:[%s2814_s10 + $0x10] sm:$0xff]  ;;  %v1364_v24 = vld [vmem:[%s2814_s10 + $0x8] sm:$0xff] }
 0x440   : > { %1255 = vbcast.lane.b32.xlu0 %v1253_v17, 256  ;;  %1248 = vbcast.lane.b32.xlu1 %v1246_v20, 256  ;;  %v1295_v27 = vrot.slane %v1242_v15, %v942_v30 }
 0x441   : > { %1804 = vmatprep.subr.mxu0 %v2240_v0 }
 0x442   : > { %1805 = vmatpush3.msra.mxu0 %v1365_v18 }
 0x443   : > { %1806 = vmatprep.subr.mxu0 %v2240_v0 }
 0x444   : > { %1276 = vbcast.lane.b32.xlu0 %v1274_v23, 256  ;;  %1262 = vbcast.lane.b32.xlu1 %v1260_v26, 256 }
 0x445   : > { %1807 = vmatpush3.msra.mxu0 %v1364_v24 }
 0x446   : > { %1808 = vmatprep.subr.mxu0 %v2240_v0 }
 0x447   : > { %1809 = vmatpush3.msra.mxu0 %v1363_v2 }
 0x448   : > { %1290 = vbcast.lane.b32.xlu0 %v1288_v29, 256  ;;  %1269 = vbcast.lane.b32.xlu1 %v1267_v32, 256 }
 0x44c   : > { %1382 = vrot.lane.b32.xlu0 %v2658_v48, %s2243_s28  ;;  %1283 = vbcast.lane.b32.xlu1 %v1281_v10, 256 }
 0x450   : > { %1479 = vrot.lane.b32.xlu0 %v1473_v21, %s2244_s26  ;;  %1297 = vbcast.lane.b32.xlu1 %v1295_v27, 256  ;;  %s2155_s26 = scalar_lea.vmem %s2154_s19, 256 }
 0x451   : > { %p2157_p12 = scmp.lt.s32.totalorder %s2155_s26, %s2149_s5 }
 0x453   : > { %p2158_p8 = por %p2157_p12, %p2156_p4 }
 0x454   : > { %1475 = vrot.lane.b32.xlu1 %v1242_v15, %s2245_s14 }
 0x455   : > { %p2159_p3 = pnand %p2158_p8, %p2152_p1 }
 0x4b2   : > { %v1256_v14 = vpop.permute.xlu0 %1255  ;;  %v1249_v30 = vpop.permute.xlu1 %1248 }
 0x4b3   : > { %v1300_v33 = vmul.f32 %v1256_v14, %v2588_v16  ;;  %v1299_v48 = vmul.f32 %v1249_v30, %v2581_v13 }
 0x4b5   : > { %v1314_v35 = vsel %vm585_vm1, %v1300_v33, 0.0  ;;  %v1307_v36 = vsel %vm585_vm1, %v1299_v48, 0.0 }
 0x4b6   : > { %v1315_v37 = vrot.slane %v1314_v35, 4  ;;  %v1308_v38 = vrot.slane %v1307_v36, 4  ;;  %v1277_v39 = vpop.permute.xlu0 %1276  ;;  %v1263_v40 = vpop.permute.xlu1 %1262 }
 0x4b7   : > { %v1303_v41 = vmul.f32 %v1277_v39, %v2615_v25  ;;  %v1301_v42 = vmul.f32 %v1263_v40, %v2595_v19 }
 0x4b8   : > { %v1316_v0 = vadd.f32 %v1315_v37, %v1314_v35  ;;  %v1309_v43 = vadd.f32 %v1308_v38, %v1307_v36 }
 0x4b9   : > { %v1335_v44 = vsel %vm585_vm1, %v1303_v41, 0.0  ;;  %v1321_v16 = vsel %vm585_vm1, %v1301_v42, 0.0 }
 0x4ba   : > { %v1317_v45 = vrot.slane %v1316_v0, 2  ;;  %v1310_v13 = vrot.slane %v1309_v43, 2  ;;  %v1336_v47 = vrot.slane %v1335_v44, 4  ;;  %v1322_v50 = vrot.slane %v1321_v16, 4  ;;  %v1291_v51 = vpop.permute.xlu0 %1290  ;;  %v1270_v1 = vpop.permute.xlu1 %1269 }
 0x4bb   : > { %v1305_v46 = vmul.f32 %v1291_v51, %v2634_v31  ;;  %v1302_v52 = vmul.f32 %v1270_v1, %v2608_v22 }
 0x4bc   : > { %v1318_v49 = vadd.f32 %v1317_v45, %v1316_v0  ;;  %v1337_v25 = vadd.f32 %v1336_v47, %v1335_v44  ;;  %v1323_v53 = vadd.f32 %v1322_v50, %v1321_v16  ;;  %v1311_v19 = vadd.f32 %v1310_v13, %v1309_v43  ;;  %v1710_v13 = vld [vmem:[%s2815_s11] ss:$0 sm:$0xff] }
 0x4bd   : > { %v1349_v54 = vsel %vm585_vm1, %v1305_v46, 0.0  ;;  %v1328_v55 = vsel %vm585_vm1, %v1302_v52, 0.0 }
 0x4be   : > { %v1324_v56 = vrot.slane %v1323_v53, 2  ;;  %v1284_v58 = vpop.permute.xlu1 %1283  ;;  %v1338_v60 = vrot.slane %v1337_v25, 2  ;;  %v1350_v61 = vrot.slane %v1349_v54, 4  ;;  %v1329_v62 = vrot.slane %v1328_v55, 4  ;;  %v1383_v16 = vpop.permute.xlu0 %1382 }
 0x4bf   : > { %v1304_v59 = vmul.f32 %v1284_v58, %v2627_v28  ;;  %v1319_v63 = vrot.slane %v1318_v49, 1  ;;  %v1312_v31 = vrot.slane %v1311_v19, 1 }
 0x4c0   : > { %v1325_v3 = vadd.f32 %v1324_v56, %v1323_v53  ;;  %v1351_v4 = vadd.f32 %v1350_v61, %v1349_v54  ;;  %v1330_v22 = vadd.f32 %v1329_v62, %v1328_v55  ;;  %v1339_v11 = vadd.f32 %v1338_v60, %v1337_v25 }
 0x4c1   : > { %v1342_v5 = vsel %vm585_vm1, %v1304_v59, 0.0  ;;  %v1320_v20 = vadd.f32 %v1319_v63, %v1318_v49  ;;  %v1313_v23 = vadd.f32 %v1312_v31, %v1311_v19 }
 0x4c2   : > { %v1326_v6 = vrot.slane %v1325_v3, 1  ;;  %v1343_v7 = vrot.slane %v1342_v5, 4  ;;  %v1298_v8 = vpop.permute.xlu1 %1297  ;;  %v1352_v12 = vrot.slane %v1351_v4, 2  ;;  %v1331_v57 = vrot.slane %v1330_v22, 2  ;;  %v1480_v19 = vpop.permute.xlu0 %1479 }
 0x4c3   : > { %v1306_v15 = vmul.f32 %v1298_v8, %v2645_v34  ;;  %v1340_v9 = vrot.slane %v1339_v11, 1  ;;  %v1375_v2 = vsel %vm1215_vm2, %v1320_v20, %v1313_v23 }
 0x4c4   : > { %v1344_v17 = vadd.f32 %v1343_v7, %v1342_v5  ;;  %v1332_v26 = vadd.f32 %v1331_v57, %v1330_v22  ;;  %v1327_v29 = vadd.f32 %v1326_v6, %v1325_v3  ;;  %v1353_v21 = vadd.f32 %v1352_v12, %v1351_v4 }
 0x4c5   : > { %v1356_v28 = vsel %vm585_vm1, %v1306_v15, 0.0  ;;  %v1341_v48 = vadd.f32 %v1340_v9, %v1339_v11 }
 0x4c6   : > { %v1345_v32 = vrot.slane %v1344_v17, 2  ;;  %v1357_v10 = vrot.slane %v1356_v28, 4  ;;  %v1333_v27 = vrot.slane %v1332_v26, 1  ;;  %v1376_v30 = vsel %vm1217_vm3, %v1327_v29, %v1375_v2  ;;  %v1476_v53 = vpop.permute.xlu1 %1475 }
 0x4c7   : > { %v1354_v35 = vrot.slane %v1353_v21, 1 }
 0x4c8   : > { %v1346_v18 = vadd.f32 %v1345_v32, %v1344_v17  ;;  %v1358_v24 = vadd.f32 %v1357_v10, %v1356_v28  ;;  %v1334_v14 = vadd.f32 %v1333_v27, %v1332_v26 }
 0x4c9   : > { %v1355_v42 = vadd.f32 %v1354_v35, %v1353_v21 }
 0x4ca   : > { %v1347_v34 = vrot.slane %v1346_v18, 1  ;;  %v1359_v33 = vrot.slane %v1358_v24, 2  ;;  %v1377_v36 = vsel %vm1219_vm4, %v1334_v14, %v1376_v30 }
 0x4cb   : > { %v1378_v39 = vsel %vm1221_vm5, %v1341_v48, %v1377_v36 }
 0x4cc   : > { %v1348_v37 = vadd.f32 %v1347_v34, %v1346_v18  ;;  %v1360_v38 = vadd.f32 %v1359_v33, %v1358_v24 }
 0x4ce   : > { %v1379_v40 = vsel %vm1223_vm6, %v1348_v37, %v1378_v39  ;;  %v1361_v41 = vrot.slane %v1360_v38, 1 }
 0x4cf   : > { %v1380_v43 = vsel %vm1225_vm7, %v1355_v42, %v1379_v40 }
 0x4d0   : > { %v1362_v0 = vadd.f32 %v1361_v41, %v1360_v38 }
 0x4d2   : > { %v1381_v44 = vsel %vm1227_vm8, %v1362_v0, %v1380_v43 }
 0x4d3   : > { %1811 = vmatmul.mubr.msk.f32.vlgmr.msra.gmra.mxu0 %vm585_vm1, %v1381_v44 }
 0x593   : > { %v1453_v45 = vpop.f32.mrf.mxu0 }
 0x594   : > { %v1454_v47 = vadd.f32 %v1453_v45, %v1383_v16 }
 0x595   : > { %v1812_v50 = vpop.f32.mrf.mxu0 }
 0x596   : > { %v1464_v51 = vadd.f32 %v1710_v13, %v1454_v47 }
 0x598   : > { %v1711_v1 = vmul.f32 -1.442695, %v1464_v51 }
 0x59a   : > { %1959 = vpow2.f32 %v1711_v1 }
 0x5a7   : > { %v1960_v46 = vpop.eup %1959 }
 0x5a8   : > { %v1468_v52 = vadd.f32 1.0, %v1960_v46 }
 0x5aa   : > { %1961 = vrcp.f32 %v1468_v52 }
 0x5b7   : > { %v1962_v49 = vpop.eup %1961 }
 0x5b8   : > { %v1472_v25 = vmul.f32 %v1962_v49, %v1381_v44 }
 0x5ba   : > { %v1482_v54 = vsel %vm585_vm1, %v1472_v25, %v1476_v53 }
 0x5bb   : > { %v1484_v55 = vsel %vm1483_vm11, %v1482_v54, %v1480_v19 }
 0x5bc   : > { %1486 = vst.msk [vmem:[%s560_s30] sm:$0xff] %vm1485_vm12, %v1484_v55 }
 0x5bd   : > { %2162 = shalt.err (!%p2159_p3)
}
 0x5be   : > { %s2163_s12 = scalar_lea.hbm %s2767_s25, 128  ;;  %s2167_s29 = scalar_lea.hbm %s2863_s17, 256 }
 0x5bf   : > { %p2164_p7 = scmp.ne.s32.totalorder %s2767_s25, %s2163_s12  ;;  %p2168_p10 = scmp.lt.s32.totalorder %s2767_s25, %s2863_s17 }
 0x5c0   : > { %p2169_p13 = scmp.lt.s32.totalorder %s2167_s29, %s2163_s12 }
 0x5c1   : > { %p2165_p6 = pnand %p2164_p7, %p2864_p9 }
 0x5c2   : > { %p2170_p0 = por %p2169_p13, %p2168_p10 }
 0x5c3   : > { %p2166_p2 = pneg %p2165_p6 }
 0x5c5   : > { %p2171_p5 = pnand %p2170_p0, %p2166_p2 }
 0x5c7   : > { %2174 = shalt.err (!%p2171_p5)
}
 0x5c8   : > { %1837 = dma.vmem_to_hbm [thread:$0]  (%p2864_p9), %s1502_s0, 128, %s2767_s25, %s1488_s27  }
 0x5c9 PF: > { %s1513_s16 = sand.u32 1, %s2217_s21   ;;  %p2865_p11 = scmp.ne.s32.totalorder %s2849_s18, 0 }
 0x5ca   : > { %p2866_p1 = scmp.ge.s32.totalorder %s2229_s24, 2  ;;  %s1514_s7 = scalar_lea.sflag [#allocation4], %s1513_s16 }
 0x5cc   : > { %p1863_p4 = pnand %p2866_p1, %p2865_p11 }
 0x5ce   : > { %p1864_p12 = pneg %p1863_p4 }
 0x5d0   : > { %2212 = dma.done.wait (%p1864_p12), %s1514_s7, 128  }
 0x5d1   : > { %2214 = vsyncadd (%p1864_p12), %s1514_s7, 4294967168  ;;  %s2867_s24 = sld [smem:[#allocation22_spill]]  ;;  %s2870_s21 = smov %s2221_s22 }
 0x5d2   : > { %s2868_s8 = sld [smem:[#allocation21_spill]] }
 0x5d3   : > { %s2869_s23 = sld [smem:[#allocation23_spill]] }
 0x5d7   : > { %p30_p8 = scmp.ge.s32.totalorder %s2867_s24, 4  }
 0x5d8   : > { %s2871_s22 = smov %s2868_s8 }
 0x5d9   :  { %32 = sbr.rel (!%p30_p8) target bundleno = 17 (0x11), region = 152 }
 0x5de   :  { %1519 = vsyncpa [#allocation3], 1 }
 0x5df   :  { %1521 = vsyncpa [#allocation3 + $0x1], 1 }
 0x5e0   :  { %1522 = vsyncpa [#allocation6], 1 }
 0x5e1   :  { %1524 = vsyncpa [#allocation6 + $0x1], 1 }
 0x5e2   :  { %1525 = vsyncpa [#allocation9], 1 }
 0x5e3   :  { %1526 = vsyncpa [#allocation12], 1 }
 0x5e4   :  { %1527 = vsyncpa [#allocation4], 1 }
 0x5e5   :  { %1529 = vsyncpa [#allocation4 + $0x1], 1 }

</bundles_post_ra>
